<compile_context>
chip_gen: v7x
topology: tpu7x:2x2x1
jax: 0.10.0
libtpu: 0.0.40
codegen_flags: <defaults>
</compile_context>

<pallas_src>
import functools

import jax
import jax.numpy as jnp
from jax.experimental import pallas as pl
from jax.experimental.pallas import tpu as pltpu


def _round_up(a, m):
    return -(-a // m) * m


def _maxpool_kernel(x_ref, sel_ref, o_ref, *, k, W, Lh):
    """One row-tile of the packed max-pool.

    x_ref:   (tr, L)   L = G*gl lanes; each group of gl = k*W lanes holds the k
                       image rows (each W = k*wo wide) of one pooling row-group.
    sel_ref: (Lh, OUT) precomputed 0/1 compaction matrix (VMEM-resident).
    o_ref:   (tr, OUT) OUT = G*wo.
    """
    x = x_ref[...]
    L = x.shape[-1]

    # ---- width pooling: sm[:, c] = max_{s<k} x[:, c+s]  (static lane slices, VPU) ----
    Ls = L - (k - 1)
    sm = x[:, :Ls]
    for s in range(1, k):
        sm = jnp.maximum(sm, x[:, s:s + Ls])

    # ---- height pooling: h[:, c] = max_{r<k} sm[:, c + r*W] (rows are W lanes apart) ----
    h = sm[:, :Lh]
    for r in range(1, k):
        h = jnp.maximum(h, sm[:, r * W:r * W + Lh])

    # ---- compaction: source column (g*k*W + jo*k) -> output column (g*wo + jo) via a
    # single selection matmul on the MXU, using the resident precomputed matrix.
    # TODO(synk): 0 * (+/-inf or NaN) inside the selection matmul can leak NaN across a
    # row-tile's output columns; switch the compaction to a lane-strided gather if
    # non-finite inputs must be supported.
    out = jnp.dot(h, sel_ref[...], preferred_element_type=jnp.float32)
    o_ref[...] = out.astype(o_ref.dtype)


def max_pool_2d(x, k=2, *, block_bytes=3 << 20, max_rows_per_tile=2048):
    """Forward pass of MP(k): nn.MaxPool2d(kernel_size=k, stride=k) on NCHW input."""
    b, c, h, w = x.shape
    ho, wo = h // k, w // k
    # PyTorch floor mode: trailing rows/cols that don't fill a window are dropped.
    x = x[:, :, :ho * k, :wo * k]

    W = wo * k                 # image-row width after crop
    gl = k * W                 # lanes per pooling row-group (k image rows)
    groups = b * c * ho        # number of pooling row-groups
    itemsize = jnp.dtype(x.dtype).itemsize

    # Lane packing: pack G row-groups per slab row so OUT = G*wo is lane-dense (>=128)
    # even when the feature map is small (avoids masked vst.msk partial stores).
    G = 1 if wo >= 128 else min(-(-128 // wo), groups)
    OUT = G * wo
    L = G * gl
    Lh = (G - 1) * gl + (wo - 1) * k + 1   # last selectable source column + 1

    # Free reshape to one row per pooling row-group.
    xg = x.reshape(groups, gl)

    rows_needed = -(-groups // G)

    # Row tiling: largest tile with ~block_bytes input blocks (amortizes per-step
    # overhead) while staying well under VMEM (v7x: 64 MiB physical) with double
    # buffering and in-kernel temporaries. Pad instead of relying on divisibility.
    cap = max(8, min(max_rows_per_tile, (block_bytes // (L * itemsize)) // 8 * 8))
    if rows_needed <= cap:
        n_tiles, tr = 1, rows_needed
    else:
        rows8 = _round_up(rows_needed, 8)
        n_tiles = -(-rows8 // cap)
        tr = _round_up(-(-rows8 // n_tiles), 8)
    rows_pad = n_tiles * tr
    groups_pad = rows_pad * G
    if groups_pad != groups:
        xg = jnp.pad(xg, ((0, groups_pad - groups), (0, 0)))
    xs = xg.reshape(rows_pad, L)

    # Precomputed 0/1 compaction matrix, passed as a grid-resident input (constant
    # index_map => fetched once, stays in VMEM across the grid).
    o_idx = jnp.arange(OUT)
    src = (o_idx // wo) * gl + (o_idx % wo) * k
    sel = (jnp.arange(Lh)[:, None] == src[None, :]).astype(x.dtype)

    # Honest scheduler hint (single matmul, review item on CostEstimate).
    flops = (k - 1) * rows_pad * (L - k + 1)       # width maxes
    flops += (k - 1) * rows_pad * Lh               # height maxes
    flops += 2 * rows_pad * Lh * OUT               # one compaction matmul
    cost = pl.CostEstimate(
        flops=int(flops),
        transcendentals=0,
        bytes_accessed=int((rows_pad * L + Lh * OUT + rows_pad * OUT) * itemsize),
    )

    out = pl.pallas_call(
        functools.partial(_maxpool_kernel, k=k, W=W, Lh=Lh),
        out_shape=jax.ShapeDtypeStruct((rows_pad, OUT), x.dtype),
        grid=(n_tiles,),
        in_specs=[
            pl.BlockSpec((tr, L), lambda i: (i, 0)),
            pl.BlockSpec((Lh, OUT), lambda i: (0, 0)),   # resident selection matrix
        ],
        out_specs=pl.BlockSpec((tr, OUT), lambda i: (i, 0)),
        compiler_params=pltpu.CompilerParams(
            dimension_semantics=("parallel",),
            vmem_limit_bytes=48 * 1024 * 1024,
        ),
        cost_estimate=cost,
    )(xs, sel)

    out = out.reshape(rows_pad * G, wo)[:groups]
    return out.reshape(b, c, ho, wo)


if __name__ == "__main__":
    # Small shapes consistent with the module: batch=2, channels=4, 16x16 spatial.
    B, C, H, W = 2, 4, 16, 16
    key = jax.random.PRNGKey(0)
    x = jax.random.normal(key, (B, C, H, W), jnp.float32)

    out = max_pool_2d(x, k=2)
    jax.block_until_ready(out)

    ref = x.reshape(B, C, H // 2, 2, W // 2, 2).max(axis=(3, 5))
    assert out.shape == (B, C, H // 2, W // 2) and out.dtype == x.dtype
    assert bool(jnp.allclose(out, ref)), "mismatch vs reference max pool"

    # Second check: non-divisible spatial dims exercise the floor-mode crop path.
    x2 = jax.random.normal(jax.random.PRNGKey(0), (1, 3, 10, 14), jnp.float32)
    out2 = max_pool_2d(x2, k=2)
    jax.block_until_ready(out2)
    ref2 = x2[:, :, :10, :14].reshape(1, 3, 5, 2, 7, 2).max(axis=(3, 5))
    assert out2.shape == (1, 3, 5, 7) and bool(jnp.allclose(out2, ref2))

    print("KERNEL_OK")
</pallas_src>

<mosaic_0001>
module attributes {stable_mosaic.version = 11 : i64} {
  func.func @_maxpool_kernel(%arg0: i32, %arg1: memref<4x512xf32, #tpu.memory_space<vmem>>, %arg2: memref<495x128xf32, #tpu.memory_space<vmem>>, %arg3: memref<4x128xf32, #tpu.memory_space<vmem>>) attributes {dimension_semantics = [#tpu.dimension_semantics<parallel>], iteration_bounds = array<i64: 1>, scalar_prefetch = 0 : i64, scratch_operands = 0 : i64, tpu.core_type = #tpu.core_type<tc>, window_params = [{transform_indices = @transform_0, window_bounds = array<i64: 4, 512>}, {pipeline_mode = #tpu.pipeline_mode<synchronous>, transform_indices = @transform_1, window_bounds = array<i64: 495, 128>}, {transform_indices = @transform_2, window_bounds = array<i64: 4, 128>}]} {
    %c0 = arith.constant 0 : index
    %c0_0 = arith.constant 0 : index
    %0 = vector.load %arg1[%c0, %c0_0] : memref<4x512xf32, #tpu.memory_space<vmem>>, vector<4x512xf32>
    %1 = vector.extract_strided_slice %0 {offsets = [0, 0], sizes = [4, 511], strides = [1, 1]} : vector<4x512xf32> to vector<4x511xf32>
    %2 = vector.extract_strided_slice %0 {offsets = [0, 1], sizes = [4, 511], strides = [1, 1]} : vector<4x512xf32> to vector<4x511xf32>
    %3 = arith.maximumf %1, %2 : vector<4x511xf32>
    %4 = vector.extract_strided_slice %3 {offsets = [0, 0], sizes = [4, 495], strides = [1, 1]} : vector<4x511xf32> to vector<4x495xf32>
    %5 = vector.extract_strided_slice %3 {offsets = [0, 16], sizes = [4, 495], strides = [1, 1]} : vector<4x511xf32> to vector<4x495xf32>
    %6 = arith.maximumf %4, %5 : vector<4x495xf32>
    %c0_1 = arith.constant 0 : index
    %c0_2 = arith.constant 0 : index
    %7 = vector.load %arg2[%c0_1, %c0_2] : memref<495x128xf32, #tpu.memory_space<vmem>>, vector<495x128xf32>
    %cst = arith.constant dense<0.000000e+00> : vector<4x128xf32>
    %8 = tpu.matmul %6, %7, %cst {dimension_numbers = #tpu.dot_dimension_numbers<[1], [0], [0], [1], [0, 0, 1, 1], [], []>} : vector<4x495xf32>, vector<495x128xf32>, vector<4x128xf32> -> vector<4x128xf32>
    %c0_3 = arith.constant 0 : index
    %c0_4 = arith.constant 0 : index
    %9 = vector.load %arg3[%c0_3, %c0_4] : memref<4x128xf32, #tpu.memory_space<vmem>>, vector<4x128xf32>
    tpu.vector_store %arg3[%c0_3, %c0_4], %8 {strides = array<i32>} : memref<4x128xf32, #tpu.memory_space<vmem>>, vector<4x128xf32>,
    return
  }
  func.func @transform_0(%arg0: i32) -> (i32, i32) {
    %c0_i32 = arith.constant 0 : i32
    %c0_i32_0 = arith.constant 0 : i32
    return %arg0, %c0_i32 : i32, i32
  }
  func.func @transform_1(%arg0: i32) -> (i32, i32) {
    %c0_i32 = arith.constant 0 : i32
    %c0_i32_0 = arith.constant 0 : i32
    %c0_i32_1 = arith.constant 0 : i32
    return %c0_i32, %c0_i32_0 : i32, i32
  }
  func.func @transform_2(%arg0: i32) -> (i32, i32) {
    %c0_i32 = arith.constant 0 : i32
    %c0_i32_0 = arith.constant 0 : i32
    return %arg0, %c0_i32 : i32, i32
  }
}

</mosaic_0001>

<bundles_post_ra>
// kernel: tpu_custom_call.1
= control target key start
LH: loop header
LB: loop body
LE: loop exit
PB: predicated region body
PF: predicated region fallthrough
CT: control target
= control target key end

     0   :  { %7 = vsyncpa [#allocation3], 0  ;;  %s594_s0 = inlined_call_operand.hbm [shape: f32[4,512], index: 0, kind: input, shape index: {}]   ;;  %s595_s1 = inlined_call_operand.hbm [shape: f32[495,128], index: 1, kind: input, shape index: {}]   ;;  %s596_s2 = inlined_call_operand.hbm [shape: f32[4,128], index: 2, kind: output, shape index: {}]  }
   0x1   :  { %8 = vsyncpa [#allocation6], 0 }
   0x2   :  { %9 = vsyncpa [#allocation4], 0  ;;  %s500_s9 = smov [#allocation2]   ;;  %s501_s11 = smov [#allocation5]  }
   0x3   :  { %s16_s10 = sshll.u32 %s500_s9, 4  ;;  %s25_s12 = sshll.u32 %s501_s11, 4  ;;  %s17_s10 = int_to_ptr.vmem [resolvable:$true] %s16_s10  ;;  %s524_s12 = int_to_ptr.vmem [resolvable:$true] %s25_s12 }
   0x4   :  { %s428_s15 = scalar_lea.hbm %s594_s0, 256 }
   0x5   :  { %p429_p0 = scmp.ne.s32.totalorder %s594_s0, %s428_s15  ;;  %p432_p1 = scmp.lt.u32.totalorder %s428_s15, %s594_s0 }
   0x7   :  { %p434_p2 = pnand %p432_p1, %p429_p0 }
   0x9   :  { %437 = shalt.err (!%p434_p2)
}
   0xa   :  { %s438_s20 = scalar_lea.vmem %s17_s10, 256  ;;  %p443_p4 = scmp.lt.s32.totalorder %s17_s10, %s17_s10 }
   0xb   :  { %p439_p3 = scmp.ne.s32.totalorder %s17_s10, %s438_s20  ;;  %p444_p5 = scmp.lt.s32.totalorder %s438_s20, %s438_s20 }
   0xd   :  { %p445_p6 = por %p444_p5, %p443_p4 }
   0xf   :  { %p446_p7 = pnand %p445_p6, %p439_p3 }
  0x11   :  { %449 = shalt.err (!%p446_p7)
}
  0x12   :  { %19 = dma.hbm_to_vmem [thread:$0]  %s594_s0, 256, %s17_s10, [#allocation3]  }
  0x13   :  { %s450_s25 = scalar_lea.hbm %s595_s1, 7936 }
  0x14   :  { %p451_p8 = scmp.ne.s32.totalorder %s595_s1, %s450_s25  ;;  %p454_p9 = scmp.lt.u32.totalorder %s450_s25, %s595_s1 }
  0x16   :  { %p456_p10 = pnand %p454_p9, %p451_p8 }
  0x18   :  { %459 = shalt.err (!%p456_p10)
}
  0x19   :  { %s460_s30 = scalar_lea.vmem %s524_s12, 7936  ;;  %p465_p12 = scmp.lt.s32.totalorder %s524_s12, %s524_s12 }
  0x1a   :  { %p461_p11 = scmp.ne.s32.totalorder %s524_s12, %s460_s30  ;;  %p466_p13 = scmp.lt.s32.totalorder %s460_s30, %s460_s30 }
  0x1c   :  { %p467_p0 = por %p466_p13, %p465_p12 }
  0x1e   :  { %p468_p1 = pnand %p467_p0, %p461_p11 }
  0x20   :  { %471 = shalt.err (!%p468_p1)
}
  0x21   :  { %s502_s0 = smov 128   ;;  %s503_s3 = smov 8  }
  0x22   :  { %31 = dma.hbm_to_vmem [thread:$0]  %s595_s1, 7936, %s524_s12, [#allocation6], %s502_s0, %s502_s0, %s503_s3  }
  0x23   :  { %494 = dma.done.wait [#allocation3], 256  }
  0x24   :  { %495 = vsyncadd [#allocation3], 4294967040 }
  0x25   :  { %496 = dma.done.wait [#allocation6], 7936  }
  0x26   :  { %497 = vsyncadd [#allocation6], 4294959360  ;;  %v555_v0 = vld [vmem:[#allocation2] sm:$0xff]  ;;  %s504_s6 = smov 127   ;;  %v558_v1 = vld [vmem:[#allocation2 + $0x8] sm:$0xff]  ;;  %v505_v5 = vmov 0.0|0.0  }
  0x27   :  { %42 = vrot.lane.b32.xlu0 %v555_v0, %s504_s6  ;;  %v105_v2 = vld [vmem:[#allocation5 + $0x100] sm:$0xff]  ;;  %v106_v3 = vld [vmem:[#allocation5 + $0x108] sm:$0xff]  ;;  %v107_v4 = vld [vmem:[#allocation5 + $0x110] sm:$0xff]  ;;  %373 = vmatprep.subr.bf16.mxu1 %v505_v5  ;;  %vm50_vm0 = vcmask 1039360   ;;  %vm48_vm1 = vcmask 1043456   ;;  %vm143_vm2 = vcmask 1046528  }
  0x28   :  { %v374_v6 = vpack.c.bf16 %v106_v3, %v105_v2  ;;  %v108_v7 = vld [vmem:[#allocation5 + $0x118] sm:$0xff]  ;;  %v109_v9 = vld [vmem:[#allocation5 + $0x120] sm:$0xff]  ;;  %v110_v10 = vld [vmem:[#allocation5 + $0x128] sm:$0xff]  ;;  %vm506_vm3 = vmmov 1   ;;  %s507_s1 = smov 112   ;;  %vm66_vm5 = vcmask 916480  }
  0x29   :  { %v377_v8 = vpack.c.bf16 %v108_v7, %v107_v4  ;;  %v89_v11 = vld [vmem:[#allocation5 + $0x80] sm:$0xff]  ;;  %v90_v12 = vld [vmem:[#allocation5 + $0x88] sm:$0xff]  ;;  %v91_v16 = vld [vmem:[#allocation5 + $0x90] sm:$0xff]  ;;  %v380_v17 = vpack.c.bf16 %v110_v10, %v109_v9  ;;  %vm140_vm6 = vcmask 908288   ;;  %s508_s7 = smov [#allocation7]  }
  0x2a   :  { %375 = vmatpush1.bf16.msra.mxu1 %v374_v6  ;;  %v341_v13 = vpack.c.bf16 %v90_v12, %v89_v11  ;;  %v73_v14 = vld [vmem:[#allocation5] sm:$0xff]  ;;  %v74_v15 = vld [vmem:[#allocation5 + $0x8] sm:$0xff]  ;;  %v111_v18 = vld [vmem:[#allocation5 + $0x130] sm:$0xff]  ;;  %s294_s8 = sshll.u32 %s508_s7, 4  ;;  %s295_s8 = int_to_ptr.vmem [resolvable:$true] %s294_s8 }
  0x2b   :  { %44 = vrot.lane.b32.xlu0 %v558_v1, %s504_s6  ;;  %376 = vmatprep.subr.bf16.mxu1 %v505_v5  ;;  %v112_v19 = vld [vmem:[#allocation5 + $0x138] sm:$0xff]  ;;  %v343_v20 = vpack.c.bf16 %v74_v15, %v73_v14  ;;  %v75_v23 = vld [vmem:[#allocation5 + $0x10] sm:$0xff]  ;;  %v93_v25 = vld [vmem:[#allocation5 + $0xa0] sm:$0xff]  ;;  %s472_s9 = scalar_lea.vmem %s295_s8, 64  ;;  %p477_p3 = scmp.lt.s32.totalorder %s295_s8, %s295_s8 }
  0x2c   :  { %v92_v21 = vld [vmem:[#allocation5 + $0x98] sm:$0xff]  ;;  %342 = vmatprep.subr.bf16.mxu0 %v341_v13  ;;  %v94_v27 = vld [vmem:[#allocation5 + $0xa8] sm:$0xff]  ;;  %v77_v29 = vld [vmem:[#allocation5 + $0x20] sm:$0xff]  ;;  %v383_v31 = vpack.c.bf16 %v112_v19, %v111_v18  ;;  %p473_p2 = scmp.ne.s32.totalorder %s295_s8, %s472_s9  ;;  %p478_p4 = scmp.lt.s32.totalorder %s472_s9, %s472_s9 }
  0x2d   :  { %v345_v22 = vpack.c.bf16 %v92_v21, %v91_v16  ;;  %v76_v24 = vld [vmem:[#allocation5 + $0x18] sm:$0xff]  ;;  %344 = vmatpush3.bf16.msra.mxu0 %v343_v20  ;;  %v349_v28 = vpack.c.bf16 %v94_v27, %v93_v25  ;;  %v78_v30 = vld [vmem:[#allocation5 + $0x28] sm:$0xff]  ;;  %v95_v32 = vld [vmem:[#allocation5 + $0xb0] sm:$0xff] }
  0x2e   :  { %378 = vmatpush1.bf16.msra.mxu1 %v377_v8  ;;  %v347_v26 = vpack.c.bf16 %v76_v24, %v75_v23  ;;  %v96_v33 = vld [vmem:[#allocation5 + $0xb8] sm:$0xff]  ;;  %v113_v34 = vld [vmem:[#allocation5 + $0x140] sm:$0xff]  ;;  %v114_v35 = vld [vmem:[#allocation5 + $0x148] sm:$0xff]  ;;  %v351_v36 = vpack.c.bf16 %v78_v30, %v77_v29  ;;  %p479_p5 = por %p478_p4, %p477_p3 }
  0x2f   :  { %379 = vmatprep.subr.bf16.mxu1 %v505_v5  ;;  %346 = vmatprep.subr.bf16.mxu0 %v345_v22  ;;  %v353_v37 = vpack.c.bf16 %v96_v33, %v95_v32  ;;  %v79_v38 = vld [vmem:[#allocation5 + $0x30] sm:$0xff]  ;;  %v80_v39 = vld [vmem:[#allocation5 + $0x38] sm:$0xff]  ;;  %v386_v40 = vpack.c.bf16 %v114_v35, %v113_v34  ;;  %v97_v41 = vld [vmem:[#allocation5 + $0xc0] sm:$0xff] }
  0x30   :  { %v98_v42 = vld [vmem:[#allocation5 + $0xc8] sm:$0xff]  ;;  %v115_v43 = vld [vmem:[#allocation5 + $0x150] sm:$0xff]  ;;  %v116_v44 = vld [vmem:[#allocation5 + $0x158] sm:$0xff]  ;;  %v355_v45 = vpack.c.bf16 %v80_v39, %v79_v38  ;;  %p480_p6 = pnand %p479_p5, %p473_p2 }
  0x31   :  { %348 = vmatpush3.bf16.msra.mxu0 %v347_v26  ;;  %v357_v46 = vpack.c.bf16 %v98_v42, %v97_v41  ;;  %v81_v47 = vld [vmem:[#allocation5 + $0x40] sm:$0xff]  ;;  %v82_v48 = vld [vmem:[#allocation5 + $0x48] sm:$0xff]  ;;  %v389_v49 = vpack.c.bf16 %v116_v44, %v115_v43  ;;  %v119_v54 = vld [vmem:[#allocation5 + $0x170] sm:$0xff] }
  0x32   :  { %381 = vmatpush1.bf16.msra.mxu1 %v380_v17  ;;  %350 = vmatprep.subr.bf16.mxu0 %v349_v28  ;;  %v117_v50 = vld [vmem:[#allocation5 + $0x160] sm:$0xff]  ;;  %v118_v51 = vld [vmem:[#allocation5 + $0x168] sm:$0xff]  ;;  %v359_v52 = vpack.c.bf16 %v82_v48, %v81_v47  ;;  %v120_v55 = vld [vmem:[#allocation5 + $0x178] sm:$0xff] }
  0x33   :  { %382 = vmatprep.subr.bf16.mxu1 %v505_v5  ;;  %v392_v53 = vpack.c.bf16 %v118_v51, %v117_v50  ;;  %v395_v56 = vpack.c.bf16 %v120_v55, %v119_v54  ;;  %v121_v57 = vld [vmem:[#allocation5 + $0x180] sm:$0xff]  ;;  %v122_v58 = vld [vmem:[#allocation5 + $0x188] sm:$0xff]  ;;  %v123_v60 = vld [vmem:[#allocation5 + $0x190] sm:$0xff] }
  0x34   :  { %v398_v59 = vpack.c.bf16 %v122_v58, %v121_v57  ;;  %v124_v61 = vld [vmem:[#allocation5 + $0x198] sm:$0xff]  ;;  %v125_v63 = vld [vmem:[#allocation5 + $0x1a0] sm:$0xff]  ;;  %v126_v2 = vld [vmem:[#allocation5 + $0x1a8] sm:$0xff] }
  0x35   :  { %352 = vmatpush3.bf16.msra.mxu0 %v351_v36  ;;  %v401_v62 = vpack.c.bf16 %v124_v61, %v123_v60  ;;  %v404_v3 = vpack.c.bf16 %v126_v2, %v125_v63  ;;  %v127_v4 = vld [vmem:[#allocation5 + $0x1b0] sm:$0xff]  ;;  %v128_v6 = vld [vmem:[#allocation5 + $0x1b8] sm:$0xff]  ;;  %v129_v10 = vld [vmem:[#allocation5 + $0x1c0] sm:$0xff] }
  0x36   :  { %384 = vmatpush1.bf16.msra.mxu1 %v383_v31  ;;  %354 = vmatprep.subr.bf16.mxu0 %v353_v37  ;;  %v407_v7 = vpack.c.bf16 %v128_v6, %v127_v4  ;;  %v99_v8 = vld [vmem:[#allocation5 + $0xd0] sm:$0xff]  ;;  %v100_v9 = vld [vmem:[#allocation5 + $0xd8] sm:$0xff]  ;;  %v130_v12 = vld [vmem:[#allocation5 + $0x1c8] sm:$0xff] }
  0x37   :  { %385 = vmatprep.subr.bf16.mxu1 %v505_v5  ;;  %v361_v11 = vpack.c.bf16 %v100_v9, %v99_v8  ;;  %v83_v13 = vld [vmem:[#allocation5 + $0x50] sm:$0xff]  ;;  %v84_v14 = vld [vmem:[#allocation5 + $0x58] sm:$0xff]  ;;  %v410_v15 = vpack.c.bf16 %v130_v12, %v129_v10  ;;  %v101_v18 = vld [vmem:[#allocation5 + $0xe0] sm:$0xff] }
  0x38   :  { %v363_v16 = vpack.c.bf16 %v84_v14, %v83_v13  ;;  %v102_v19 = vld [vmem:[#allocation5 + $0xe8] sm:$0xff]  ;;  %v131_v20 = vld [vmem:[#allocation5 + $0x1d0] sm:$0xff]  ;;  %v132_v22 = vld [vmem:[#allocation5 + $0x1d8] sm:$0xff] }
  0x39   :  { %356 = vmatpush3.bf16.msra.mxu0 %v355_v45  ;;  %v365_v21 = vpack.c.bf16 %v102_v19, %v101_v18  ;;  %v85_v23 = vld [vmem:[#allocation5 + $0x60] sm:$0xff]  ;;  %v86_v24 = vld [vmem:[#allocation5 + $0x68] sm:$0xff]  ;;  %v413_v25 = vpack.c.bf16 %v132_v22, %v131_v20  ;;  %v103_v29 = vld [vmem:[#allocation5 + $0xf0] sm:$0xff] }
  0x3a   :  { %387 = vmatpush1.bf16.msra.mxu1 %v386_v40  ;;  %358 = vmatprep.subr.bf16.mxu0 %v357_v46  ;;  %v367_v26 = vpack.c.bf16 %v86_v24, %v85_v23  ;;  %v104_v30 = vld [vmem:[#allocation5 + $0xf8] sm:$0xff]  ;;  %v133_v31 = vld [vmem:[#allocation5 + $0x1e0] sm:$0xff]  ;;  %v134_v34 = vld [vmem:[#allocation5 + $0x1e8] sm:$0x7f] }
  0x3b   :  { %388 = vmatprep.subr.bf16.mxu1 %v505_v5  ;;  %v369_v33 = vpack.c.bf16 %v104_v30, %v103_v29  ;;  %v87_v35 = vld [vmem:[#allocation5 + $0x70] sm:$0xff]  ;;  %v416_v36 = vpack.c.bf16 %v134_v34, %v133_v31  ;;  %vm417_vm4 = vmpackc.low %vm143_vm2, %vm506_vm3  ;;  %v88_v37 = vld [vmem:[#allocation5 + $0x78] sm:$0xff] }
  0x3c   :  { %v371_v39 = vpack.c.bf16 %v88_v37, %v87_v35 }
  0x3d   :  { %360 = vmatpush3.bf16.msra.mxu0 %v359_v52 }
  0x3e   :  { %390 = vmatpush1.bf16.msra.mxu1 %v389_v49  ;;  %362 = vmatprep.subr.bf16.mxu0 %v361_v11 }
  0x3f   :  { %391 = vmatprep.subr.bf16.mxu1 %v505_v5 }
  0x41   :  { %364 = vmatpush3.bf16.msra.mxu0 %v363_v16 }
  0x42   :  { %393 = vmatpush1.bf16.msra.mxu1 %v392_v53  ;;  %366 = vmatprep.subr.bf16.mxu0 %v365_v21 }
  0x43   :  { %394 = vmatprep.subr.bf16.mxu1 %v505_v5 }
  0x45   :  { %368 = vmatpush3.bf16.msra.mxu0 %v367_v26 }
  0x46   :  { %396 = vmatpush1.bf16.msra.mxu1 %v395_v56  ;;  %370 = vmatprep.subr.bf16.mxu0 %v369_v33 }
  0x47   :  { %397 = vmatprep.subr.bf16.mxu1 %v505_v5 }
  0x49   :  { %372 = vmatpush3.bf16.msra.mxu0 %v371_v39 }
  0x4a   :  { %399 = vmatpush1.bf16.msra.mxu1 %v398_v59 }
  0x4b   :  { %400 = vmatprep.subr.bf16.mxu1 %v505_v5 }
  0x4e   :  { %402 = vmatpush1.bf16.msra.mxu1 %v401_v62 }
  0x4f   :  { %403 = vmatprep.subr.bf16.mxu1 %v505_v5 }
  0x52   :  { %405 = vmatpush1.bf16.msra.mxu1 %v404_v3 }
  0x53   :  { %406 = vmatprep.subr.bf16.mxu1 %v505_v5 }
  0x56   :  { %408 = vmatpush1.bf16.msra.mxu1 %v407_v7 }
  0x57   :  { %409 = vmatprep.subr.bf16.mxu1 %v505_v5 }
  0x5a   :  { %411 = vmatpush1.bf16.msra.mxu1 %v410_v15 }
  0x5b   :  { %412 = vmatprep.subr.bf16.mxu1 %v505_v5 }
  0x5e   :  { %414 = vmatpush1.bf16.msra.mxu1 %v413_v25 }
  0x5f   :  { %415 = vmatprep.subr.bf16.mxu1 %v505_v5 }
  0x62   :  { %418 = vmatpush1.bf16.msk.msra.mxu1 %vm417_vm4, %v416_v36 }
  0x99   :  { %v43_v17 = vpop.permute.xlu0 %42 }
  0x9a   :  { %v46_v27 = vrot.slane %v43_v17, 4 }
  0x9d   :  { %v45_v28 = vpop.permute.xlu0 %44 }
  0x9e   :  { %v47_v32 = vrot.slane %v45_v28, 4 }
  0xa0   :  { %v49_v38 = vsel %vm48_vm1, %v46_v27, %v47_v32  ;;  %v52_v5 = vsel %vm50_vm0, %v45_v28, %v47_v32 }
  0xa1   :  { %v51_v40 = vsel %vm50_vm0, %v43_v17, %v49_v38  ;;  %v56_v42 = vmax.f32 %v558_v1, %v52_v5 }
  0xa2   :  { %v55_v41 = vmax.f32 %v555_v0, %v51_v40 }
  0xa4   :  { %59 = vrot.lane.b32.xlu1 %v55_v41, %s507_s1 }
  0xa8   :  { %61 = vrot.lane.b32.xlu1 %v56_v42, %s507_s1 }
 0x116   :  { %v60_v43 = vpop.permute.xlu1 %59 }
 0x117   :  { %v63_v45 = vrot.slane %v60_v43, 4 }
 0x11a   :  { %v62_v44 = vpop.permute.xlu1 %61 }
 0x11b   :  { %v64_v46 = vrot.slane %v62_v44, 4 }
 0x11d   :  { %v65_v47 = vsel %vm48_vm1, %v63_v45, %v64_v46  ;;  %v68_v48 = vsel %vm66_vm5, %v62_v44, %v64_v46 }
 0x11e   :  { %v72_v49 = vmax.f32 %v56_v42, %v68_v48  ;;  %v67_v50 = vsel %vm66_vm5, %v60_v43, %v65_v47 }
 0x11f   :  { %v71_v0 = vmax.f32 %v55_v41, %v67_v50 }
 0x120   :  { %v138_v51 = vcombine.high %v72_v49, %v72_v49 }
 0x121   :  { %v137_v52 = vcombine.high %v71_v0, %v71_v0 }
 0x122   :  { %305 = vmatprep.mubr.msk.f32.mxu1 %vm140_vm6, %v138_v51 }
 0x123   :  { %211 = vmatprep.mubr.f32.mxu0 %v137_v52  ;;  %282 = vmatmul.mubr.f32.vlgmr.msra.gmra.mrb[0].mxu1 %v72_v49 }
 0x124   :  { %212 = vmatmul.mubr.f32.vlgmr.msra.gmra.mrb[0].mxu0 %v71_v0 }
 0x1f6   :  { %v283_v1 = vpop.f32.mrb[0].mxu1 }
 0x1f7   :  { %v338_v53 = vpop.f32.mrb[0].mxu0  ;;  %v285_v54 = vpop.f32.mrb[1].mxu1 }
 0x1f8   :  { %v339_v55 = vpop.f32.mrb[1].mxu0 }
 0x1f9   :  { %v340_v56 = vadd.f32 %v339_v55, %v338_v53 }
 0x1fb   :  { %v284_v57 = vadd.f32 %v340_v56, %v283_v1 }
 0x1fd   :  { %287 = vst [vmem:[#allocation7] sm:$0xf] %v284_v57 }
 0x1fe   :  { %483 = shalt.err (!%p480_p6)
}
 0x1ff   :  { %s484_s12 = scalar_lea.hbm %s596_s2, 64 }
 0x200   :  { %p485_p7 = scmp.ne.s32.totalorder %s596_s2, %s484_s12  ;;  %p488_p8 = scmp.lt.u32.totalorder %s484_s12, %s596_s2 }
 0x202   :  { %p490_p9 = pnand %p488_p8, %p485_p7 }
 0x204   :  { %493 = shalt.err (!%p490_p9)
}
 0x205   :  { %297 = dma.vmem_to_hbm [thread:$0]  %s295_s8, 64, %s596_s2, [#allocation4]  }
 0x206   :  { %498 = dma.done.wait [#allocation4], 64  }
 0x207   :  { %499 = vsyncadd [#allocation4], 4294967232 }
 0x208   :  { %301 = vsyncpa [#allocation3], 1 }
 0x209   :  { %302 = vsyncpa [#allocation6], 1 }
 0x20a   :  { %303 = vsyncpa [#allocation4], 1 }

</bundles_post_ra>
